<compile_context>
chip_gen: v6e
topology: v6e:2x2x1
jax: 0.10.0
libtpu: 0.0.40
codegen_flags: <defaults>
</compile_context>

<pallas_src>
import math

import jax
import jax.numpy as jnp
from jax.experimental import pallas as pl
from jax.experimental.pallas import tpu as pltpu

_VMEM_LIMIT_BYTES = 48 * 1024 * 1024  # under v7x's 64 MiB physical, plenty on v5e/v6e


def _cdiv(a, b):
    return -(-a // b)


def _round_up(a, b):
    return _cdiv(a, b) * b


def _pick_rows(cp, np_needed, num_shards, block_bytes):
    """Rows per block of the packed (Np, Cp) view: multiple of 8, ~block_bytes."""
    rows = max(8, (block_bytes // (cp * 4)) // 8 * 8)
    # Don't over-pad tiny inputs: at most ~one block per shard when N is small.
    rows = min(rows, _round_up(max(1, _cdiv(np_needed, num_shards)), 8))
    return max(8, rows)


# ---------------------------------------------------------------------------
# Kernel 1: per-channel sum / sum-of-squares over the (packed) row axis.
# Output blocks are indexed only by the shard axis, so they stay resident in
# VMEM across the inner "arbitrary" reduction axis and serve as accumulators
# directly (no scratch buffers).
# ---------------------------------------------------------------------------
def _stats_kernel(x_ref, sum_ref, sumsq_ref):
    @pl.when(pl.program_id(1) == 0)
    def _():
        sum_ref[...] = jnp.zeros_like(sum_ref)
        sumsq_ref[...] = jnp.zeros_like(sumsq_ref)

    xb = x_ref[...].astype(jnp.float32)
    sum_ref[...] += jnp.sum(xb, axis=0, keepdims=True)
    sumsq_ref[...] += jnp.sum(xb * xb, axis=0, keepdims=True)


def _channel_sums(xp, rows, num_shards, steps):
    np_, cp = xp.shape
    assert np_ == num_shards * steps * rows
    out_spec = pl.BlockSpec((None, 1, cp), lambda s, i: (s, 0, 0))
    return pl.pallas_call(
        _stats_kernel,
        out_shape=(jax.ShapeDtypeStruct((num_shards, 1, cp), jnp.float32),
                   jax.ShapeDtypeStruct((num_shards, 1, cp), jnp.float32)),
        grid_spec=pltpu.PrefetchScalarGridSpec(
            num_scalar_prefetch=0,
            grid=(num_shards, steps),
            in_specs=[pl.BlockSpec((rows, cp), lambda s, i: (s * steps + i, 0))],
            out_specs=(out_spec, out_spec)),
        compiler_params=pltpu.CompilerParams(
            dimension_semantics=("parallel", "arbitrary"),
            vmem_limit_bytes=_VMEM_LIMIT_BYTES),
    )(xp)


# ---------------------------------------------------------------------------
# Kernel 2: elementwise normalize with the affine folded in:
#   y = x * scale + shift,  scale = rect*w/sqrt(var+eps), shift = b - mu*scale
# ---------------------------------------------------------------------------
def _norm_kernel(x_ref, scale_ref, shift_ref, o_ref):
    x = x_ref[...].astype(jnp.float32)
    o_ref[...] = (x * scale_ref[...] + shift_ref[...]).astype(o_ref.dtype)


def _normalize(xp, scale_p, shift_p, rows):
    np_, cp = xp.shape
    assert np_ % rows == 0
    vec_spec = pl.BlockSpec((1, cp), lambda i: (0, 0))
    return pl.pallas_call(
        _norm_kernel,
        out_shape=jax.ShapeDtypeStruct((np_, cp), xp.dtype),
        grid_spec=pltpu.PrefetchScalarGridSpec(
            num_scalar_prefetch=0,
            grid=(np_ // rows,),
            in_specs=[pl.BlockSpec((rows, cp), lambda i: (i, 0)),
                      vec_spec, vec_spec],
            out_specs=pl.BlockSpec((rows, cp), lambda i: (i, 0))),
        compiler_params=pltpu.CompilerParams(
            dimension_semantics=("parallel",),
            vmem_limit_bytes=_VMEM_LIMIT_BYTES),
    )(xp, scale_p, shift_p)


# ---------------------------------------------------------------------------
# Module-equivalent functional wrapper.
# ---------------------------------------------------------------------------
def init_rectify_bn_state(num_features, affine=True):
    c = num_features
    return {
        "weight": jnp.ones((1, c), jnp.float32) if affine else None,
        "bias": jnp.zeros((1, c), jnp.float32) if affine else None,
        "running_mean": jnp.zeros((1, c), jnp.float32),
        "running_var": jnp.ones((1, c), jnp.float32),
        "diff_mean": jnp.zeros((1, c), jnp.float32),
        "diff_var": jnp.zeros((1, c), jnp.float32),
        "num_batches_tracked": 0,  # Python int (host-side, mirrors torch .item())
    }


def rectify_batch_norm(x, state, *, training=True, mask=None, eps=1e-5,
                       betas=(0.9, 0.99), affine=True,
                       block_bytes=4 << 20, num_shards=2):
    # TODO(synk): `mask is not None` path (torch.masked_select -> ragged
    # effective batch) has no static Pallas tiling; only mask=None is supported.
    assert mask is None, "mask path not implemented"
    B, T, C = x.shape
    N = B * T
    x2d = x.reshape(N, C)
    new_state = dict(state)

    # Lane packing: fold k rows into one packed row so the minor dim is >= 128.
    k = 128 // C if (C < 128 and 128 % C == 0) else 1
    cp = k * C
    np_needed = _cdiv(N, k)
    rows = _pick_rows(cp, np_needed, num_shards, block_bytes)
    steps = max(1, _cdiv(np_needed, rows * num_shards))
    np_pad = num_shards * steps * rows
    n_pad = np_pad * k
    if n_pad > N:
        x2d = jnp.pad(x2d, ((0, n_pad - N), (0, 0)))
    xp = x2d.reshape(np_pad, cp)

    if training:
        ps, psq = _channel_sums(xp, rows, num_shards, steps)
        s = ps.reshape(num_shards * k, C).sum(axis=0, keepdims=True)
        sq = psq.reshape(num_shards * k, C).sum(axis=0, keepdims=True)
        mean = s / N
        # E[x^2] - E[x]^2, clamped: f32 cancellation can push it slightly
        # negative; torch's mean((x-mean)^2) is non-negative by construction.
        var = jnp.maximum(sq / N - mean * mean, 0.0)

        beta1, beta2 = betas
        # TODO(synk): num_batches_tracked and the `if N_sma >= 5` branch are
        # host-side Python (matches torch's .item()); under jax.jit pass t as a
        # static argument or re-derive rect on traced scalars.
        t = int(state["num_batches_tracked"]) + 1
        bcc1 = 1.0 - beta1 ** t
        bcc2 = 1.0 - beta2 ** t

        diff_mean = state["diff_mean"] * beta1 + mean * (1.0 - beta1)
        diff_var = state["diff_var"] * beta2 + var * (1.0 - beta2)

        beta2_t = beta2 ** t
        n_sma_max = 2.0 / (1.0 - beta2) - 1.0
        n_sma = n_sma_max - 2.0 * t * beta2_t / (1.0 - beta2_t)
        if n_sma >= 5:
            rect = math.sqrt((n_sma - 4.0) / (n_sma_max - 4.0) * (n_sma - 2.0)
                             * n_sma_max / n_sma / (n_sma_max - 2.0))
            rect *= math.sqrt(bcc2)
        else:
            rect = math.sqrt(bcc2)

        mu = diff_mean / bcc1
        inv = rect / jnp.sqrt(diff_var + eps)

        new_state.update(diff_mean=diff_mean, diff_var=diff_var,
                         running_mean=diff_mean, running_var=diff_var,
                         num_batches_tracked=t)
    else:
        mu = state["running_mean"]
        inv = 1.0 / jnp.sqrt(state["running_var"] + eps)

    # Fold affine into per-channel vectors: y = x*scale + shift.
    w = state["weight"] if affine else 1.0
    b = state["bias"] if affine else 0.0
    scale = (inv * w).astype(jnp.float32)
    shift = (b - mu * scale).astype(jnp.float32)
    scale_p = jnp.tile(scale, (1, k))
    shift_p = jnp.tile(shift, (1, k))

    yp = _normalize(xp, scale_p, shift_p, rows)
    y = yp.reshape(n_pad, C)[:N].reshape(B, T, C)
    return y, new_state


# ---------------------------------------------------------------------------
# Pure-JAX reference (mirrors the torch forward) for a correctness check.
# ---------------------------------------------------------------------------
def _reference(x, state, *, training, eps, betas, affine):
    C = x.shape[2]
    xe = x.reshape(-1, C).astype(jnp.float32)
    if training:
        mean = jnp.mean(xe, axis=0)
        var = jnp.mean((xe - mean) ** 2, axis=0)
        beta1, beta2 = betas
        t = int(state["num_batches_tracked"]) + 1
        bcc1, bcc2 = 1.0 - beta1 ** t, 1.0 - beta2 ** t
        diff_mean = state["diff_mean"] * beta1 + mean[None, :] * (1 - beta1)
        diff_var = state["diff_var"] * beta2 + var[None, :] * (1 - beta2)
        beta2_t = beta2 ** t
        n_sma_max = 2.0 / (1.0 - beta2) - 1.0
        n_sma = n_sma_max - 2.0 * t * beta2_t / (1.0 - beta2_t)
        if n_sma >= 5:
            rect = math.sqrt((n_sma - 4) / (n_sma_max - 4) * (n_sma - 2)
                             * n_sma_max / n_sma / (n_sma_max - 2)) * math.sqrt(bcc2)
        else:
            rect = math.sqrt(bcc2)
        y = rect * (x - diff_mean / bcc1) / jnp.sqrt(diff_var + eps)
    else:
        y = (x - state["running_mean"]) / jnp.sqrt(state["running_var"] + eps)
    if affine:
        y = y * state["weight"] + state["bias"]
    return y


if __name__ == "__main__":
    key = jax.random.PRNGKey(0)

    def check(B, T, C, n_train_steps=2):
        kcfg = jax.random.fold_in(key, B * 10000 + T * 100 + C)
        state = init_rectify_bn_state(C, affine=True)
        for s in range(n_train_steps):
            ks = jax.random.fold_in(kcfg, s)
            x = jax.random.normal(ks, (B, T, C), dtype=jnp.float32) * 2.0 + 0.5
            y, new_state = rectify_batch_norm(x, state, training=True)
            y = jax.block_until_ready(y)
            y_ref = _reference(x, state, training=True, eps=1e-5,
                               betas=(0.9, 0.99), affine=True)
            assert jnp.allclose(y, y_ref, atol=1e-4, rtol=1e-4), \
                f"train mismatch B={B} T={T} C={C} step={s}"
            state = new_state
        xe = jax.random.normal(jax.random.fold_in(kcfg, 999), (B, T, C),
                               dtype=jnp.float32)
        ye, _ = rectify_batch_norm(xe, state, training=False)
        ye = jax.block_until_ready(ye)
        ye_ref = _reference(xe, state, training=False, eps=1e-5,
                            betas=(0.9, 0.99), affine=True)
        assert jnp.allclose(ye, ye_ref, atol=1e-4, rtol=1e-4), \
            f"eval mismatch B={B} T={T} C={C}"

    check(2, 8, 32)   # C < 128: lane-packed path (k=4), padded N
    check(3, 7, 48)   # C doesn't divide 128: unpacked path, ragged N padding
    print("KERNEL_OK")
</pallas_src>

<mosaic_0001>
module attributes {stable_mosaic.version = 11 : i64} {
  func.func @_stats_kernel(%arg0: i32, %arg1: i32, %arg2: memref<8x128xf32, #tpu.memory_space<vmem>>, %arg3: memref<1x1x128xf32, #tpu.memory_space<vmem>>, %arg4: memref<1x1x128xf32, #tpu.memory_space<vmem>>) attributes {dimension_semantics = [#tpu.dimension_semantics<parallel>, #tpu.dimension_semantics<arbitrary>], iteration_bounds = array<i64: 2, 1>, scalar_prefetch = 0 : i64, scratch_operands = 0 : i64, tpu.core_type = #tpu.core_type<tc>, window_params = [{transform_indices = @transform_0, window_bounds = array<i64: 8, 128>}, {transform_indices = @transform_1, window_bounds = array<i64: 1, 1, 128>}, {transform_indices = @transform_2, window_bounds = array<i64: 1, 1, 128>}]} {
    %c0_i32 = arith.constant 0 : i32
    %0 = arith.cmpi eq, %arg1, %c0_i32 : i32
    %1 = arith.extui %0 : i1 to i32
    %c0_i32_0 = arith.constant 0 : i32
    %2 = arith.cmpi ne, %1, %c0_i32_0 : i32
    scf.if %2 {
      %cst_15 = arith.constant 0.000000e+00 : f32
      %21 = vector.broadcast %cst_15 : f32 to vector<1x128xf32>
      %c0_16 = arith.constant 0 : index
      %c0_17 = arith.constant 0 : index
      %c0_18 = arith.constant 0 : index
      %22 = vector.load %arg3[%c0_16, %c0_17, %c0_18] : memref<1x1x128xf32, #tpu.memory_space<vmem>>, vector<1x1x128xf32>
      %23 = vector.shape_cast %22 : vector<1x1x128xf32> to vector<1x128xf32>
      %24 = vector.shape_cast %21 : vector<1x128xf32> to vector<1x1x128xf32>
      tpu.vector_store %arg3[%c0_16, %c0_17, %c0_18], %24 {strides = array<i32>} : memref<1x1x128xf32, #tpu.memory_space<vmem>>, vector<1x1x128xf32>,
      %cst_19 = arith.constant 0.000000e+00 : f32
      %25 = vector.broadcast %cst_19 : f32 to vector<1x128xf32>
      %c0_20 = arith.constant 0 : index
      %c0_21 = arith.constant 0 : index
      %c0_22 = arith.constant 0 : index
      %26 = vector.load %arg4[%c0_20, %c0_21, %c0_22] : memref<1x1x128xf32, #tpu.memory_space<vmem>>, vector<1x1x128xf32>
      %27 = vector.shape_cast %26 : vector<1x1x128xf32> to vector<1x128xf32>
      %28 = vector.shape_cast %25 : vector<1x128xf32> to vector<1x1x128xf32>
      tpu.vector_store %arg4[%c0_20, %c0_21, %c0_22], %28 {strides = array<i32>} : memref<1x1x128xf32, #tpu.memory_space<vmem>>, vector<1x1x128xf32>,
    } else {
    }
    %c0 = arith.constant 0 : index
    %c0_1 = arith.constant 0 : index
    %3 = vector.load %arg2[%c0, %c0_1] : memref<8x128xf32, #tpu.memory_space<vmem>>, vector<8x128xf32>
    %c0_2 = arith.constant 0 : index
    %c0_3 = arith.constant 0 : index
    %c0_4 = arith.constant 0 : index
    %4 = vector.load %arg3[%c0_2, %c0_3, %c0_4] : memref<1x1x128xf32, #tpu.memory_space<vmem>>, vector<1x1x128xf32>
    %5 = vector.shape_cast %4 : vector<1x1x128xf32> to vector<1x128xf32>
    %cst = arith.constant dense<0.000000e+00> : vector<128xf32>
    %6 = vector.multi_reduction <add>, %3, %cst [0] : vector<8x128xf32> to vector<128xf32>
    %7 = vector.shape_cast %6 : vector<128xf32> to vector<1x128xf32>
    %8 = arith.addf %5, %7 : vector<1x128xf32>
    %c0_5 = arith.constant 0 : index
    %c0_6 = arith.constant 0 : index
    %c0_7 = arith.constant 0 : index
    %9 = vector.load %arg3[%c0_5, %c0_6, %c0_7] : memref<1x1x128xf32, #tpu.memory_space<vmem>>, vector<1x1x128xf32>
    %10 = vector.shape_cast %9 : vector<1x1x128xf32> to vector<1x128xf32>
    %11 = vector.shape_cast %8 : vector<1x128xf32> to vector<1x1x128xf32>
    tpu.vector_store %arg3[%c0_5, %c0_6, %c0_7], %11 {strides = array<i32>} : memref<1x1x128xf32, #tpu.memory_space<vmem>>, vector<1x1x128xf32>,
    %c0_8 = arith.constant 0 : index
    %c0_9 = arith.constant 0 : index
    %c0_10 = arith.constant 0 : index
    %12 = vector.load %arg4[%c0_8, %c0_9, %c0_10] : memref<1x1x128xf32, #tpu.memory_space<vmem>>, vector<1x1x128xf32>
    %13 = vector.shape_cast %12 : vector<1x1x128xf32> to vector<1x128xf32>
    %14 = arith.mulf %3, %3 : vector<8x128xf32>
    %cst_11 = arith.constant dense<0.000000e+00> : vector<128xf32>
    %15 = vector.multi_reduction <add>, %14, %cst_11 [0] : vector<8x128xf32> to vector<128xf32>
    %16 = vector.shape_cast %15 : vector<128xf32> to vector<1x128xf32>
    %17 = arith.addf %13, %16 : vector<1x128xf32>
    %c0_12 = arith.constant 0 : index
    %c0_13 = arith.constant 0 : index
    %c0_14 = arith.constant 0 : index
    %18 = vector.load %arg4[%c0_12, %c0_13, %c0_14] : memref<1x1x128xf32, #tpu.memory_space<vmem>>, vector<1x1x128xf32>
    %19 = vector.shape_cast %18 : vector<1x1x128xf32> to vector<1x128xf32>
    %20 = vector.shape_cast %17 : vector<1x128xf32> to vector<1x1x128xf32>
    tpu.vector_store %arg4[%c0_12, %c0_13, %c0_14], %20 {strides = array<i32>} : memref<1x1x128xf32, #tpu.memory_space<vmem>>, vector<1x1x128xf32>,
    return
  }
  func.func @transform_0(%arg0: i32, %arg1: i32) -> (i32, i32) {
    %c1_i32 = arith.constant 1 : i32
    %0 = arith.muli %arg0, %c1_i32 : i32
    %1 = arith.addi %0, %arg1 : i32
    %c0_i32 = arith.constant 0 : i32
    %c0_i32_0 = arith.constant 0 : i32
    return %1, %c0_i32 : i32, i32
  }
  func.func @transform_1(%arg0: i32, %arg1: i32) -> (i32, i32, i32) {
    %c0_i32 = arith.constant 0 : i32
    %c0_i32_0 = arith.constant 0 : i32
    %c0_i32_1 = arith.constant 0 : i32
    return %arg0, %c0_i32, %c0_i32_0 : i32, i32, i32
  }
  func.func @transform_2(%arg0: i32, %arg1: i32) -> (i32, i32, i32) {
    %c0_i32 = arith.constant 0 : i32
    %c0_i32_0 = arith.constant 0 : i32
    %c0_i32_1 = arith.constant 0 : i32
    return %arg0, %c0_i32, %c0_i32_0 : i32, i32, i32
  }
}

</mosaic_0001>

<bundles_post_ra>
// kernel: tpu_custom_call.1
= control target key start
LH: loop header
LB: loop body
LE: loop exit
PB: predicated region body
PF: predicated region fallthrough
CT: control target
= control target key end

     0   :  { %8 = vsyncpa [#allocation3], 0  ;;  %s764_s0 = inlined_call_operand.hbm [shape: f32[16,128], index: 0, kind: input, shape index: {}]   ;;  %s765_s1 = inlined_call_operand.hbm [shape: f32[2,1,128], index: 1, kind: output, shape index: {0}]   ;;  %s766_s2 = inlined_call_operand.hbm [shape: f32[2,1,128], index: 2, kind: output, shape index: {1}]  }
   0x1   :  { %10 = vsyncpa [#allocation3 + $0x1], 0 }
   0x2   :  { %11 = vsyncpa [#allocation4], 0 }
   0x3   :  { %13 = vsyncpa [#allocation4 + $0x1], 0 }
   0x4   :  { %14 = vsyncpa [#allocation7], 0 }
   0x5   :  { %16 = vsyncpa [#allocation7 + $0x1], 0  ;;  %s582_s9 = smov 0   ;;  %s584_s10 = smov 0  }
   0x6   :  { %s586_s11 = smov 0   ;;  %s588_s12 = smov 0  }
   0x7   :  { %s590_s13 = smov 0   ;;  %s592_s14 = smov 0  }
   0x8 LB: > { %s343_s15 = sadd.s32 4294967295, %s561_s14   ;;  %s344_s16 = sadd.s32 4294967294, %s561_s14   ;;  %s561_s14 = sphi %s592_s14, %s22_s14   ;;  %s557_s13 = sphi %s590_s13, %s778_s13   ;;  %s553_s12 = sphi %s588_s12, %s777_s12   ;;  %s549_s11 = sphi %s586_s11, %s776_s11   ;;  %s545_s10 = sphi %s584_s10, %s775_s10   ;;  %s541_s9 = sphi %s582_s9, %s774_s9  }
   0x9   : > { %s34_s17 = sadd.s32 1, %s557_s13  ;;  %s43_s18 = sadd.s32 1, %s549_s11 }
   0xa   : > { %p36_p0 = scmp.ge.s32.totalorder %s34_s17, 2  ;;  %p50_p1 = scmp.ne.s32.totalorder %s549_s11, %s545_s10 }
   0xb   : > { %p51_p2 = scmp.eq.s32.totalorder %s561_s14, 0  ;;  %p56_p3 = scmp.ne.s32.totalorder %s545_s10, %s541_s9 }
   0xc   : > { %s780_s17 = smov (%p36_p0, %s34_s17), 0  ;;  %p57_p5 = scmp.eq.s32.totalorder %s343_s15, 0 }
   0xd   : > { %p623_p4 = por %p51_p2, %p50_p1  ;;  %s40_s20 = ssub.s32 %s557_s13, %s780_s17 }
   0xe   : > { %p80_p6 = scmp.eq.s32.totalorder %s343_s15, 1  ;;  %p41_p7 = scmp.eq.s32.totalorder %s40_s20, 0 }
   0xf   : > { %p629_p8 = por %p57_p5, %p56_p3  ;;  %p86_p10 = scmp.eq.s32.totalorder %s344_s16, 1 }
  0x10   : > { %p633_p9 = por %p80_p6, %p50_p1  ;;  %p372_p13 = scmp.lt.s32.totalorder %s561_s14, 2 }
  0x11   : > { %s638_s23 = scalar_select %p41_p7, %s549_s11, %s43_s18  }
  0x12   : > { %p640_p11 = por %p86_p10, %p56_p3  ;;  %s132_s25 = sand.u32 1, %s549_s11  }
  0x13   : > { %s347_s26 = sshll.u32 %s132_s25, 3  ;;  %s348_s27 = sshll.u32 %s557_s13, 7 }
  0x14   : > { %s770_s24 = scalar_select %p640_p11, 1, 0 }
  0x15   : > { %s142_s30 = scalar_lea.hbm %s764_s0, %s348_s27  ;;  %s136_s3 = scalar_lea.vmem [#allocation2], %s347_s26 }
  0x16   : > { %s144_s4 = sshll.u32 %s136_s3, 4  ;;  %p653_p0 = pnand %p372_p13, %p623_p4  ;;  %s145_s4 = int_to_ptr.vmem [resolvable:$true] %s144_s4 }
  0x17   : > { %p349_p1 = scmp.ge.s32.totalorder %s561_s14, 1  ;;  %p149_p2 = scmp.lt.s32.totalorder %s561_s14, 3 }
  0x18   : > { %s133_s6 = scalar_lea.sflag [#allocation3], %s132_s25  ;;  %p425_p3 = pneg %p653_p0 }
  0x19   : > { %s436_s7 = scalar_lea.vmem %s145_s4, 128  ;;  %s563_s8 = smov [#allocation2]  }
  0x1a   : > { %p437_p5 = scmp.ne.s32.totalorder %s145_s4, %s436_s7  ;;  %s441_s15 = sshll.u32 %s563_s8, 4  ;;  %s442_s15 = int_to_ptr.vmem [resolvable:$false] %s441_s15 }
  0x1b   : > { %s443_s16 = scalar_lea.vmem %s442_s15, 256  ;;  %p444_p10 = scmp.lt.s32.totalorder %s145_s4, %s442_s15 }
  0x1c   : > { %p439_p6 = pnand %p437_p5, %p425_p3  ;;  %p445_p12 = scmp.lt.s32.totalorder %s443_s16, %s436_s7 }
  0x1e   : > { %p440_p7 = pneg %p439_p6  ;;  %p446_p4 = por %p445_p12, %p444_p10 }
  0x20   : > { %p447_p13 = pnand %p446_p4, %p440_p7 }
  0x22   : > { %450 = shalt.err (!%p447_p13)
}
  0x23   : > { %364 = dma.hbm_to_vmem [thread:$0]  (!%p653_p0), %s142_s30, 128, %s145_s4, %s133_s6  }
  0x24   : > { %p150_p11 = pnand %p349_p1, %p149_p2 }
  0x25   : > { %s668_s18 = sand.u32 (!%p150_p11), 1, %s545_s10  }
  0x26   : > { %153 = sbr.rel (%p150_p11) target bundleno = 94 (0x5e), region = 24  ;;  %s350_s19 = sshll.u32 (!%p150_p11), %s668_s18, 3 }
  0x27   : > { %s156_s20 = scalar_lea.sflag (!%p150_p11), [#allocation3], %s668_s18  ;;  %s159_s25 = scalar_lea.vmem (!%p150_p11), [#allocation2], %s350_s19 }
  0x2b   : > { %528 = dma.done.wait (%p629_p8), %s156_s20, 128  }
  0x2c   : > { %530 = vsyncadd (%p629_p8), %s156_s20, 4294967168  ;;  %s176_s26 = scalar_lea.vmem [#allocation5], %s668_s18  ;;  %v564_v0 = vmov 0.0   ;;  %s678_s27 = scalar_lea.vmem [#allocation6], %s668_s18  ;;  %v190_v1 = vld [vmem:[%s159_s25] sm:$0xff] }
  0x2d   : > { %188 = vst [vmem:[%s176_s26] sm:$0x1] %v564_v0  ;;  %189 = vst [vmem:[%s678_s27] sm:$0x1] %v564_v0  ;;  %v192_v2 = vrot.slane %v190_v1, 4  ;;  %v201_v3 = vmul.f32 %v190_v1, %v190_v1  ;;  %s351_s21 = sshll.u32 %s553_s12, 4  ;;  %s227_s28 = sshll.u32 %s176_s26, 4  ;;  %s689_s28 = int_to_ptr.vmem [resolvable:$true] %s227_s28 }
  0x2e   : > { %s240_s29 = sshll.u32 %s678_s27, 4  ;;  %s687_s4 = scalar_lea.hbm %s765_s1, %s351_s21  ;;  %s696_s29 = int_to_ptr.vmem [resolvable:$true] %s240_s29 }
  0x2f   : > { %v193_v4 = vadd.f32 %v192_v2, %v190_v1  ;;  %v202_v5 = vrot.slane %v201_v3, 4  ;;  %s694_s6 = scalar_lea.hbm %s766_s2, %s351_s21  ;;  %s211_s7 = scalar_lea.sflag [#allocation4], %s668_s18 }
  0x30   : > { %s451_s8 = scalar_lea.vmem %s689_s28, 16  ;;  %s565_s15 = smov [#allocation5]  }
  0x31   : > { %v194_v6 = vrot.slane %v193_v4, 2  ;;  %v203_v7 = vadd.f32 %v202_v5, %v201_v3  ;;  %p452_p8 = scmp.ne.s32.totalorder %s689_s28, %s451_s8  ;;  %s455_s16 = sshll.u32 %s565_s15, 4  ;;  %s456_s16 = int_to_ptr.vmem [resolvable:$false] %s455_s16 }
  0x32   : > { %s457_s19 = scalar_lea.vmem %s456_s16, 32  ;;  %p458_p0 = scmp.lt.s32.totalorder %s689_s28, %s456_s16 }
  0x33   : > { %v195_v8 = vadd.f32 %v194_v6, %v193_v4  ;;  %v204_v9 = vrot.slane %v203_v7, 2  ;;  %p453_p11 = pnand %p452_p8, %p633_p9  ;;  %p459_p1 = scmp.lt.s32.totalorder %s457_s19, %s451_s8 }
  0x34   : > { %v191_v12 = vld [vmem:[%s176_s26] sm:$0x1] }
  0x35   : > { %v196_v10 = vrot.slane %v195_v8, 1  ;;  %v205_v11 = vadd.f32 %v204_v9, %v203_v7  ;;  %v200_v15 = vld [vmem:[%s678_s27] sm:$0x1]  ;;  %p454_p12 = pneg %p453_p11  ;;  %p460_p2 = por %p459_p1, %p458_p0 }
  0x37   : > { %v197_v13 = vadd.f32 %v196_v10, %v195_v8  ;;  %v206_v14 = vrot.slane %v205_v11, 1  ;;  %p461_p3 = pnand %p460_p2, %p454_p12 }
  0x39   : > { %v198_v16 = vadd.f32 %v197_v13, %v191_v12  ;;  %v207_v17 = vadd.f32 %v206_v14, %v205_v11 }
  0x3b   : > { %199 = vst [vmem:[%s176_s26] sm:$0x1] %v198_v16  ;;  %v208_v18 = vadd.f32 %v207_v17, %v200_v15 }
  0x3c   : > { %464 = shalt.err (!%p461_p3)
}
  0x3d   : > { %s465_s20 = scalar_lea.hbm %s687_s4, 16  ;;  %s469_s21 = scalar_lea.hbm %s765_s1, 32 }
  0x3e   : > { %p466_p5 = scmp.ne.s32.totalorder %s687_s4, %s465_s20  ;;  %p470_p10 = scmp.lt.s32.totalorder %s687_s4, %s765_s1 }
  0x3f   : > { %p471_p4 = scmp.lt.s32.totalorder %s469_s21, %s465_s20 }
  0x40   : > { %p467_p6 = pnand %p466_p5, %p633_p9 }
  0x41   : > { %p472_p13 = por %p471_p4, %p470_p10 }
  0x42   : > { %p468_p7 = pneg %p467_p6 }
  0x44   : > { %p473_p8 = pnand %p472_p13, %p468_p7 }
  0x46   : > { %476 = shalt.err (!%p473_p8)
}
  0x47   : > { %357 = dma.vmem_to_hbm [thread:$0]  (%p633_p9), %s689_s28, 16, %s687_s4, %s211_s7   ;;  %209 = vst [vmem:[%s678_s27] sm:$0x1] %v208_v18 }
  0x48   : > { %s215_s12 = scalar_lea.sflag [#allocation7], %s668_s18  ;;  %s477_s5 = scalar_lea.vmem %s696_s29, 16 }
  0x49   : > { %p478_p11 = scmp.ne.s32.totalorder %s696_s29, %s477_s5  ;;  %s566_s8 = smov [#allocation6]  }
  0x4a   : > { %s481_s15 = sshll.u32 %s566_s8, 4  ;;  %s482_s15 = int_to_ptr.vmem [resolvable:$false] %s481_s15 }
  0x4b   : > { %p479_p12 = pnand %p478_p11, %p633_p9  ;;  %s483_s16 = scalar_lea.vmem %s482_s15, 32 }
  0x4c   : > { %p484_p1 = scmp.lt.s32.totalorder %s696_s29, %s482_s15  ;;  %p485_p2 = scmp.lt.s32.totalorder %s483_s16, %s477_s5 }
  0x4d   : > { %p480_p0 = pneg %p479_p12 }
  0x4e   : > { %p486_p3 = por %p485_p2, %p484_p1 }
  0x50   : > { %p487_p5 = pnand %p486_p3, %p480_p0 }
  0x52   : > { %490 = shalt.err (!%p487_p5)
}
  0x53   : > { %s491_s27 = scalar_lea.hbm %s694_s6, 16  ;;  %s495_s4 = scalar_lea.hbm %s766_s2, 32 }
  0x54   : > { %p492_p6 = scmp.ne.s32.totalorder %s694_s6, %s491_s27  ;;  %p496_p4 = scmp.lt.s32.totalorder %s694_s6, %s766_s2 }
  0x55   : > { %p497_p13 = scmp.lt.s32.totalorder %s495_s4, %s491_s27 }
  0x56   : > { %p493_p7 = pnand %p492_p6, %p633_p9 }
  0x57   : > { %p498_p8 = por %p497_p13, %p496_p4 }
  0x58   : > { %p494_p10 = pneg %p493_p7 }
  0x5a   : > { %p499_p11 = pnand %p498_p8, %p494_p10 }
  0x5c   : > { %502 = shalt.err (!%p499_p11)
}
  0x5d   : > { %358 = dma.vmem_to_hbm [thread:$0]  (%p633_p9), %s696_s29, 16, %s694_s6, %s215_s12  }
  0x5e PF: > { %s252_s20 = sand.u32 1, %s541_s9   ;;  %p772_p12 = scmp.ne.s32.totalorder %s770_s24, 0 }
  0x5f   : > { %p773_p0 = scmp.ge.s32.totalorder %s561_s14, 2  ;;  %s253_s25 = scalar_lea.sflag [#allocation4], %s252_s20 }
  0x61   : > { %p366_p1 = pnand %p773_p0, %p772_p12 }
  0x63   : > { %p367_p2 = pneg %p366_p1 }
  0x65   : > { %532 = dma.done.wait (%p367_p2), %s253_s25, 16  }
  0x66   : > { %534 = vsyncadd (%p367_p2), %s253_s25, 4294967280  ;;  %s261_s26 = scalar_lea.sflag [#allocation7], %s252_s20 }
  0x67   : > { %536 = dma.done.wait (%p367_p2), %s261_s26, 16  }
  0x68   : > { %538 = vsyncadd (%p367_p2), %s261_s26, 4294967280  ;;  %s22_s14 = sadd.s32 1, %s561_s14   ;;  %s774_s9 = smov %s545_s10 }
  0x69   : > { %p19_p3 = scmp.ge.s32.totalorder %s22_s14, 4   ;;  %s775_s10 = smov %s549_s11 }
  0x6a   : > { %s776_s11 = smov %s638_s23  ;;  %s777_s12 = smov %s557_s13 }
  0x6b   : > { %s778_s13 = smov %s780_s17  ;;  %21 = sbr.rel (!%p19_p3) target bundleno = 8 (0x8), region = 90 }
  0x70   :  { %265 = vsyncpa [#allocation3], 1 }
  0x71   :  { %267 = vsyncpa [#allocation3 + $0x1], 1 }
  0x72   :  { %268 = vsyncpa [#allocation4], 1 }
  0x73   :  { %270 = vsyncpa [#allocation4 + $0x1], 1 }
  0x74   :  { %271 = vsyncpa [#allocation7], 1 }
  0x75   :  { %273 = vsyncpa [#allocation7 + $0x1], 1 }

</bundles_post_ra>
